<compile_context>
chip_gen: v5e
topology: v5e:2x2
jax: 0.10.0
libtpu: 0.0.40
codegen_flags: <defaults>
</compile_context>

<pallas_src>
import functools

import jax
import jax.numpy as jnp
from jax.experimental import pallas as pl
from jax.experimental.pallas import tpu as pltpu


def _encoder_attention_kernel(x_ref, wq_ref, wk_ref, wv_ref, adj_ref, mask_ref,
                              o_ref, acc_ref, *, num_head: int, d: int,
                              inv_tp: float, compute_dtype):
    # x_ref:    (bt, n_a, C)      batch-row tile (f32; residual stays f32)
    # w*_ref:   (C, C)            projection weights (W.T), compute_dtype, resident
    # adj_ref:  (1, bt, n_a, n_a) adjacency bias, f32
    # mask_ref: (1, bt, n_a, n_a) attention mask, int8 (nonzero = masked)
    # o_ref:    (bt, n_a, C)      lane-dense output tile (attention + residual)
    # acc_ref:  (bt, n_a, C)      f32 scratch slab for per-head outputs
    bt, n_a, C = x_ref.shape

    # Full-width projections as one lane-dense (bt*n_a, C) x (C, C) MXU matmul.
    x_c = x_ref[...].reshape(bt * n_a, C).astype(compute_dtype)
    q = jnp.dot(x_c, wq_ref[...], preferred_element_type=jnp.float32)
    k = jnp.dot(x_c, wk_ref[...], preferred_element_type=jnp.float32)
    v = jnp.dot(x_c, wv_ref[...], preferred_element_type=jnp.float32)

    q3 = q.reshape(bt, n_a, C).astype(compute_dtype)
    k3 = k.reshape(bt, n_a, C).astype(compute_dtype)
    v3 = v.reshape(bt, n_a, C).astype(compute_dtype)

    # Fold mask + adjacency into ONE additive f32 bias, in-kernel (shared by
    # all heads).  A large finite negative avoids the -inf/NaN edge case for
    # fully-masked rows (reference would be NaN there anyway).
    mask_f = mask_ref[0].astype(jnp.float32)                 # (bt, n_a, n_a)
    bias = jnp.where(mask_f > 0.0, jnp.float32(-1e30), adj_ref[0])

    # Static unroll over heads (num_head is small).  Each head's result is
    # stored into the scratch slab so its (bt, n_a, n_a) temporaries die before
    # the next head; no trailing concatenate/relayout.
    for h in range(num_head):
        sl = slice(h * d, (h + 1) * d)
        qh = q3[:, :, sl]                                    # (bt, n_a, d)
        kh = k3[:, :, sl]
        vh = v3[:, :, sl]

        # q @ k^T without materializing k.T (contract last dims, batch over bt).
        s = jnp.einsum('bqd,bkd->bqk', qh, kh,
                       preferred_element_type=jnp.float32)   # (bt, n_a, n_a)
        s = s * inv_tp + bias

        # Numerically stable softmax in f32; the divide becomes a reciprocal
        # folded into the (bt, n_a, d) output scale (flash-style).
        m = jnp.max(s, axis=-1, keepdims=True)
        e = jnp.exp(s - m)
        denom = jnp.sum(e, axis=-1, keepdims=True)
        inv_denom = pl.reciprocal(denom, approx=False)       # approx=True too
                                                             # coarse for 1e-5.
        oh = jnp.einsum('bqk,bkd->bqd', e.astype(compute_dtype), vh,
                        preferred_element_type=jnp.float32)  # (bt, n_a, d)
        acc_ref[:, :, sl] = oh * inv_denom

    # Fuse the residual and do a single lane-dense C-wide store.
    o_ref[...] = (acc_ref[...] + x_ref[...].astype(jnp.float32)).astype(o_ref.dtype)


def _pick_batch_tile(n_b: int, n_a: int, C: int, w_itemsize: int) -> int:
    """Largest divisor of n_b whose blocks + temporaries fit a VMEM budget."""
    budget = 48 * 1024 * 1024
    best = 1
    for bt in range(1, n_b + 1):
        if n_b % bt:
            continue
        if bt * n_a > 512:          # keep the projection M-tile modest
            continue
        blocks = 2 * (2 * bt * n_a * C * 4            # x + out, double-buffered
                      + bt * n_a * n_a * (4 + 1))     # adj + mask, double-buffered
        weights = 2 * 3 * C * C * w_itemsize          # resident (C, C) weights
        scratch = bt * n_a * C * 4                    # acc slab
        temps = 4 * bt * n_a * n_a * 4                # bias/s/e f32 temporaries
        if blocks + weights + scratch + temps <= budget:
            best = bt
    return best


def _default_compute_dtype():
    # bf16 MXU operands on v6e/v7x (f32 accumulation + f32 softmax); f32 elsewhere.
    try:
        kind = jax.devices()[0].device_kind.lower()
    except Exception:
        kind = ""
    return jnp.bfloat16 if ("v6" in kind or "v7" in kind) else jnp.float32


def encoder_attention(x, wq, wk, wv, mask, adjacency, *, num_head: int,
                      temperature_coeff: float = 2.0, compute_dtype=None,
                      batch_tile=None):
    """
    x:          (n_b, n_a, C) float32
    wq/wk/wv:   (C, C) float32, PyTorch nn.Linear weight layout (out, in)
    mask:       (1, n_b, n_a, n_a) bool (True = masked)
    adjacency:  (1, n_b, n_a, n_a) float32
    returns:    (n_b, n_a, C) float32  (attention output + residual)
    """
    n_b, n_a, C = x.shape
    assert C % num_head == 0
    d = C // num_head
    tp = (temperature_coeff * d) ** 0.5

    if compute_dtype is None:
        compute_dtype = _default_compute_dtype()
    w_itemsize = jnp.dtype(compute_dtype).itemsize

    # PyTorch Linear: y = x @ W.T -> pass W.T so the kernel does x @ w.
    wq_t = wq.T.astype(compute_dtype)
    wk_t = wk.T.astype(compute_dtype)
    wv_t = wv.T.astype(compute_dtype)

    # Mask stays a 1-byte stream; the select happens in-kernel.
    mask_i8 = mask.astype(jnp.int8)
    adj_f32 = adjacency.astype(jnp.float32)

    if batch_tile is None:
        batch_tile = _pick_batch_tile(n_b, n_a, C, w_itemsize)
    assert n_b % batch_tile == 0, (n_b, batch_tile)
    grid = (n_b // batch_tile,)
    # Note: on v7x (2 TCs/chip) a grid extent of 1 leaves one core idle; pass
    # batch_tile explicitly if TC balance matters more than per-step MXU fill.

    kernel = functools.partial(
        _encoder_attention_kernel,
        num_head=num_head, d=d, inv_tp=1.0 / tp, compute_dtype=compute_dtype)

    # Explicit scoped-VMEM limit (v5e defaults to 16 MiB): block working set
    # with headroom, clamped to a safe range.
    block_bytes = (2 * (2 * batch_tile * n_a * C * 4)
                   + 2 * batch_tile * n_a * n_a * (4 + 1)
                   + 2 * 3 * C * C * w_itemsize
                   + batch_tile * n_a * C * 4
                   + 4 * batch_tile * n_a * n_a * 4)
    vmem_limit = int(min(100 * 1024 * 1024, max(32 * 1024 * 1024, 2 * block_bytes)))

    # Advisory cost hint for XLA scheduling around the custom call.
    flops = int(n_b * (6 * n_a * C * C + 4 * n_a * n_a * C))
    transcendentals = int(n_b * num_head * n_a * n_a)
    bytes_accessed = int(2 * 4 * n_b * n_a * C            # x read + out write
                         + 4 * n_b * n_a * n_a            # adjacency (f32)
                         + 1 * n_b * n_a * n_a             # mask (int8)
                         + 3 * C * C * w_itemsize)         # weights

    out = pl.pallas_call(
        kernel,
        out_shape=jax.ShapeDtypeStruct((n_b, n_a, C), x.dtype),
        grid_spec=pltpu.PrefetchScalarGridSpec(
            num_scalar_prefetch=0,
            grid=grid,
            in_specs=[
                pl.BlockSpec((batch_tile, n_a, C), lambda b: (b, 0, 0)),       # x
                pl.BlockSpec((C, C), lambda b: (0, 0)),                        # wq.T
                pl.BlockSpec((C, C), lambda b: (0, 0)),                        # wk.T
                pl.BlockSpec((C, C), lambda b: (0, 0)),                        # wv.T
                pl.BlockSpec((1, batch_tile, n_a, n_a), lambda b: (0, b, 0, 0)),  # adjacency
                pl.BlockSpec((1, batch_tile, n_a, n_a), lambda b: (0, b, 0, 0)),  # mask (int8)
            ],
            out_specs=pl.BlockSpec((batch_tile, n_a, C), lambda b: (b, 0, 0)),
            scratch_shapes=[pltpu.VMEM((batch_tile, n_a, C), jnp.float32)],
        ),
        compiler_params=pltpu.CompilerParams(
            dimension_semantics=("parallel",),
            vmem_limit_bytes=vmem_limit),
        cost_estimate=pl.CostEstimate(flops=flops,
                                      transcendentals=transcendentals,
                                      bytes_accessed=bytes_accessed),
    )(x, wq_t, wk_t, wv_t, adj_f32, mask_i8)
    return out


def _reference(x, wq, wk, wv, mask, adjacency, *, num_head, temperature_coeff=2.0):
    n_b, n_a, C = x.shape
    d = C // num_head
    tp = (temperature_coeff * d) ** 0.5
    q = (x @ wq.T).reshape(n_b, n_a, num_head, d).transpose(2, 0, 1, 3)
    k_t = (x @ wk.T).reshape(n_b, n_a, num_head, d).transpose(2, 0, 3, 1)
    v = (x @ wv.T).reshape(n_b, n_a, num_head, d).transpose(2, 0, 1, 3)
    a = q @ k_t / tp + adjacency
    a = jnp.where(mask, -jnp.inf, a)
    alpha = jax.nn.softmax(a, axis=-1)
    out = (alpha @ v).transpose(1, 2, 0, 3).reshape(n_b, n_a, C)
    return out + x


if __name__ == "__main__":
    n_b, n_a, channel, num_head = 2, 8, 32, 4

    key = jax.random.PRNGKey(0)
    kx, kq, kk, kv, ka, km = jax.random.split(key, 6)

    x = jax.random.normal(kx, (n_b, n_a, channel), dtype=jnp.float32)
    # nn.Linear(channel, channel, bias=False) weight shape: (out, in)
    scale = 1.0 / (channel ** 0.5)
    wq = jax.random.uniform(kq, (channel, channel), jnp.float32, -scale, scale)
    wk = jax.random.uniform(kk, (channel, channel), jnp.float32, -scale, scale)
    wv = jax.random.uniform(kv, (channel, channel), jnp.float32, -scale, scale)

    adjacency = jax.random.normal(ka, (1, n_b, n_a, n_a), dtype=jnp.float32)
    # Boolean mask (True = masked). Keep diagonal unmasked so no row is all masked.
    mask = jax.random.uniform(km, (1, n_b, n_a, n_a)) < 0.2
    eye = jnp.eye(n_a, dtype=bool)[None, None]
    mask = jnp.where(eye, False, mask)

    ref = _reference(x, wq, wk, wv, mask, adjacency, num_head=num_head)

    # Exact f32 path.
    out = encoder_attention(x, wq, wk, wv, mask, adjacency,
                            num_head=num_head, temperature_coeff=2.0,
                            compute_dtype=jnp.float32)
    out = jax.block_until_ready(out)
    assert out.shape == (n_b, n_a, channel)
    assert jnp.allclose(out, ref, atol=1e-5, rtol=1e-5), "f32 mismatch vs reference"

    # Auto compute dtype (bf16 on v6e/v7x, f32 otherwise); relaxed tolerance
    # covers both since accumulation and softmax stay f32.
    out_auto = encoder_attention(x, wq, wk, wv, mask, adjacency,
                                 num_head=num_head, temperature_coeff=2.0)
    out_auto = jax.block_until_ready(out_auto)
    assert jnp.allclose(out_auto, ref, atol=5e-2, rtol=5e-2), "auto-dtype mismatch vs reference"

    print("KERNEL_OK")
</pallas_src>

<mosaic_0001>
module attributes {stable_mosaic.version = 11 : i64} {
  func.func @_encoder_attention_kernel(%arg0: i32, %arg1: memref<2x8x32xf32, #tpu.memory_space<vmem>>, %arg2: memref<32x32xf32, #tpu.memory_space<vmem>>, %arg3: memref<32x32xf32, #tpu.memory_space<vmem>>, %arg4: memref<32x32xf32, #tpu.memory_space<vmem>>, %arg5: memref<1x2x8x8xf32, #tpu.memory_space<vmem>>, %arg6: memref<1x2x8x8xi8, #tpu.memory_space<vmem>>, %arg7: memref<2x8x32xf32, #tpu.memory_space<vmem>>, %arg8: memref<2x8x32xf32, #tpu.memory_space<vmem>>) attributes {dimension_semantics = [#tpu.dimension_semantics<parallel>], iteration_bounds = array<i64: 1>, scalar_prefetch = 0 : i64, scratch_operands = 1 : i64, tpu.core_type = #tpu.core_type<tc>, window_params = [{transform_indices = @transform_0, window_bounds = array<i64: 2, 8, 32>}, {pipeline_mode = #tpu.pipeline_mode<synchronous>, transform_indices = @transform_1, window_bounds = array<i64: 32, 32>}, {pipeline_mode = #tpu.pipeline_mode<synchronous>, transform_indices = @transform_2, window_bounds = array<i64: 32, 32>}, {pipeline_mode = #tpu.pipeline_mode<synchronous>, transform_indices = @transform_3, window_bounds = array<i64: 32, 32>}, {transform_indices = @transform_4, window_bounds = array<i64: 1, 2, 8, 8>}, {transform_indices = @transform_5, window_bounds = array<i64: 1, 2, 8, 8>}, {transform_indices = @transform_6, window_bounds = array<i64: 2, 8, 32>}]} {
    %c0 = arith.constant 0 : index
    %c0_0 = arith.constant 0 : index
    %c0_1 = arith.constant 0 : index
    %0 = vector.load %arg1[%c0, %c0_0, %c0_1] : memref<2x8x32xf32, #tpu.memory_space<vmem>>, vector<2x8x32xf32>
    %1 = vector.shape_cast %0 : vector<2x8x32xf32> to vector<16x32xf32>
    %c0_2 = arith.constant 0 : index
    %c0_3 = arith.constant 0 : index
    %2 = vector.load %arg2[%c0_2, %c0_3] : memref<32x32xf32, #tpu.memory_space<vmem>>, vector<32x32xf32>
    %cst = arith.constant dense<0.000000e+00> : vector<16x32xf32>
    %3 = tpu.matmul %1, %2, %cst {dimension_numbers = #tpu.dot_dimension_numbers<[1], [0], [0], [1], [0, 0, 1, 1], [], []>} : vector<16x32xf32>, vector<32x32xf32>, vector<16x32xf32> -> vector<16x32xf32>
    %c0_4 = arith.constant 0 : index
    %c0_5 = arith.constant 0 : index
    %4 = vector.load %arg3[%c0_4, %c0_5] : memref<32x32xf32, #tpu.memory_space<vmem>>, vector<32x32xf32>
    %cst_6 = arith.constant dense<0.000000e+00> : vector<16x32xf32>
    %5 = tpu.matmul %1, %4, %cst_6 {dimension_numbers = #tpu.dot_dimension_numbers<[1], [0], [0], [1], [0, 0, 1, 1], [], []>} : vector<16x32xf32>, vector<32x32xf32>, vector<16x32xf32> -> vector<16x32xf32>
    %c0_7 = arith.constant 0 : index
    %c0_8 = arith.constant 0 : index
    %6 = vector.load %arg4[%c0_7, %c0_8] : memref<32x32xf32, #tpu.memory_space<vmem>>, vector<32x32xf32>
    %cst_9 = arith.constant dense<0.000000e+00> : vector<16x32xf32>
    %7 = tpu.matmul %1, %6, %cst_9 {dimension_numbers = #tpu.dot_dimension_numbers<[1], [0], [0], [1], [0, 0, 1, 1], [], []>} : vector<16x32xf32>, vector<32x32xf32>, vector<16x32xf32> -> vector<16x32xf32>
    %8 = vector.shape_cast %3 : vector<16x32xf32> to vector<2x8x32xf32>
    %9 = vector.shape_cast %5 : vector<16x32xf32> to vector<2x8x32xf32>
    %10 = vector.shape_cast %7 : vector<16x32xf32> to vector<2x8x32xf32>
    %c0_10 = arith.constant 0 : index
    %c0_11 = arith.constant 0 : index
    %c0_12 = arith.constant 0 : index
    %c0_13 = arith.constant 0 : index
    %11 = vector.load %arg6[%c0_10, %c0_11, %c0_12, %c0_13] : memref<1x2x8x8xi8, #tpu.memory_space<vmem>>, vector<1x2x8x8xi8>
    %12 = vector.shape_cast %11 : vector<1x2x8x8xi8> to vector<2x8x8xi8>
    %13 = arith.sitofp %12 : vector<2x8x8xi8> to vector<2x8x8xf32>
    %cst_14 = arith.constant 0.000000e+00 : f32
    %14 = vector.broadcast %cst_14 : f32 to vector<2x8x8xf32>
    %15 = arith.cmpf ogt, %13, %14 : vector<2x8x8xf32>
    %c0_15 = arith.constant 0 : index
    %c0_16 = arith.constant 0 : index
    %c0_17 = arith.constant 0 : index
    %c0_18 = arith.constant 0 : index
    %16 = vector.load %arg5[%c0_15, %c0_16, %c0_17, %c0_18] : memref<1x2x8x8xf32, #tpu.memory_space<vmem>>, vector<1x2x8x8xf32>
    %17 = vector.shape_cast %16 : vector<1x2x8x8xf32> to vector<2x8x8xf32>
    %cst_19 = arith.constant -1.000000e+30 : f32
    %18 = vector.broadcast %cst_19 : f32 to vector<2x8x8xf32>
    %19 = arith.select %15, %18, %17 : vector<2x8x8xi1>, vector<2x8x8xf32>
    %20 = vector.extract_strided_slice %8 {offsets = [0, 0, 0], sizes = [2, 8, 8], strides = [1, 1, 1]} : vector<2x8x32xf32> to vector<2x8x8xf32>
    %21 = vector.extract_strided_slice %9 {offsets = [0, 0, 0], sizes = [2, 8, 8], strides = [1, 1, 1]} : vector<2x8x32xf32> to vector<2x8x8xf32>
    %22 = vector.extract_strided_slice %10 {offsets = [0, 0, 0], sizes = [2, 8, 8], strides = [1, 1, 1]} : vector<2x8x32xf32> to vector<2x8x8xf32>
    "tpu.trace_start"() <{level = 10 : i32, message = "bqd,bkd->bqk"}> : () -> ()
    %cst_20 = arith.constant dense<0.000000e+00> : vector<2x8x8xf32>
    %23 = tpu.matmul %20, %21, %cst_20 {dimension_numbers = #tpu.dot_dimension_numbers<[2], [2], [1], [1], [0, 0, 0, 1, 1, 1], [0], [0]>} : vector<2x8x8xf32>, vector<2x8x8xf32>, vector<2x8x8xf32> -> vector<2x8x8xf32>
    "tpu.trace_stop"() : () -> ()
    %cst_21 = arith.constant 2.500000e-01 : f32
    %24 = vector.broadcast %cst_21 : f32 to vector<2x8x8xf32>
    %25 = arith.mulf %23, %24 : vector<2x8x8xf32>
    %26 = arith.addf %25, %19 : vector<2x8x8xf32>
    %cst_22 = arith.constant dense<0xFF800000> : vector<2x8xf32>
    %27 = vector.multi_reduction <maximumf>, %26, %cst_22 [2] : vector<2x8x8xf32> to vector<2x8xf32>
    %28 = vector.shape_cast %27 : vector<2x8xf32> to vector<2x8x1xf32>
    %29 = vector.broadcast %28 : vector<2x8x1xf32> to vector<2x8x8xf32>
    %30 = arith.subf %26, %29 : vector<2x8x8xf32>
    %31 = math.exp %30 : vector<2x8x8xf32>
    %cst_23 = arith.constant dense<0.000000e+00> : vector<2x8xf32>
    %32 = vector.multi_reduction <add>, %31, %cst_23 [2] : vector<2x8x8xf32> to vector<2x8xf32>
    %33 = vector.shape_cast %32 : vector<2x8xf32> to vector<2x8x1xf32>
    %34 = tpu.reciprocal %33 : vector<2x8x1xf32> -> vector<2x8x1xf32>
    "tpu.trace_start"() <{level = 10 : i32, message = "bqk,bkd->bqd"}> : () -> ()
    %cst_24 = arith.constant dense<0.000000e+00> : vector<2x8x8xf32>
    %35 = tpu.matmul %31, %22, %cst_24 {dimension_numbers = #tpu.dot_dimension_numbers<[2], [1], [1], [2], [0, 0, 0, 1, 1, 2], [0], [0]>} : vector<2x8x8xf32>, vector<2x8x8xf32>, vector<2x8x8xf32> -> vector<2x8x8xf32>
    "tpu.trace_stop"() : () -> ()
    %36 = vector.broadcast %34 : vector<2x8x1xf32> to vector<2x8x8xf32>
    %37 = arith.mulf %35, %36 : vector<2x8x8xf32>
    %c0_25 = arith.constant 0 : index
    %c0_26 = arith.constant 0 : index
    %c0_27 = arith.constant 0 : index
    %38 = vector.load %arg8[%c0_25, %c0_26, %c0_27] : memref<2x8x32xf32, #tpu.memory_space<vmem>>, vector<2x8x8xf32>
    tpu.vector_store %arg8[%c0_25, %c0_26, %c0_27], %37 {strides = array<i32>} : memref<2x8x32xf32, #tpu.memory_space<vmem>>, vector<2x8x8xf32>,
    %39 = vector.extract_strided_slice %8 {offsets = [0, 0, 8], sizes = [2, 8, 8], strides = [1, 1, 1]} : vector<2x8x32xf32> to vector<2x8x8xf32>
    %40 = vector.extract_strided_slice %9 {offsets = [0, 0, 8], sizes = [2, 8, 8], strides = [1, 1, 1]} : vector<2x8x32xf32> to vector<2x8x8xf32>
    %41 = vector.extract_strided_slice %10 {offsets = [0, 0, 8], sizes = [2, 8, 8], strides = [1, 1, 1]} : vector<2x8x32xf32> to vector<2x8x8xf32>
    "tpu.trace_start"() <{level = 10 : i32, message = "bqd,bkd->bqk"}> : () -> ()
    %cst_28 = arith.constant dense<0.000000e+00> : vector<2x8x8xf32>
    %42 = tpu.matmul %39, %40, %cst_28 {dimension_numbers = #tpu.dot_dimension_numbers<[2], [2], [1], [1], [0, 0, 0, 1, 1, 1], [0], [0]>} : vector<2x8x8xf32>, vector<2x8x8xf32>, vector<2x8x8xf32> -> vector<2x8x8xf32>
    "tpu.trace_stop"() : () -> ()
    %cst_29 = arith.constant 2.500000e-01 : f32
    %43 = vector.broadcast %cst_29 : f32 to vector<2x8x8xf32>
    %44 = arith.mulf %42, %43 : vector<2x8x8xf32>
    %45 = arith.addf %44, %19 : vector<2x8x8xf32>
    %cst_30 = arith.constant dense<0xFF800000> : vector<2x8xf32>
    %46 = vector.multi_reduction <maximumf>, %45, %cst_30 [2] : vector<2x8x8xf32> to vector<2x8xf32>
    %47 = vector.shape_cast %46 : vector<2x8xf32> to vector<2x8x1xf32>
    %48 = vector.broadcast %47 : vector<2x8x1xf32> to vector<2x8x8xf32>
    %49 = arith.subf %45, %48 : vector<2x8x8xf32>
    %50 = math.exp %49 : vector<2x8x8xf32>
    %cst_31 = arith.constant dense<0.000000e+00> : vector<2x8xf32>
    %51 = vector.multi_reduction <add>, %50, %cst_31 [2] : vector<2x8x8xf32> to vector<2x8xf32>
    %52 = vector.shape_cast %51 : vector<2x8xf32> to vector<2x8x1xf32>
    %53 = tpu.reciprocal %52 : vector<2x8x1xf32> -> vector<2x8x1xf32>
    "tpu.trace_start"() <{level = 10 : i32, message = "bqk,bkd->bqd"}> : () -> ()
    %cst_32 = arith.constant dense<0.000000e+00> : vector<2x8x8xf32>
    %54 = tpu.matmul %50, %41, %cst_32 {dimension_numbers = #tpu.dot_dimension_numbers<[2], [1], [1], [2], [0, 0, 0, 1, 1, 2], [0], [0]>} : vector<2x8x8xf32>, vector<2x8x8xf32>, vector<2x8x8xf32> -> vector<2x8x8xf32>
    "tpu.trace_stop"() : () -> ()
    %55 = vector.broadcast %53 : vector<2x8x1xf32> to vector<2x8x8xf32>
    %56 = arith.mulf %54, %55 : vector<2x8x8xf32>
    %c0_33 = arith.constant 0 : index
    %c0_34 = arith.constant 0 : index
    %c8 = arith.constant 8 : index
    %57 = vector.load %arg8[%c0_33, %c0_34, %c8] : memref<2x8x32xf32, #tpu.memory_space<vmem>>, vector<2x8x8xf32>
    tpu.vector_store %arg8[%c0_33, %c0_34, %c8], %56 {strides = array<i32>} : memref<2x8x32xf32, #tpu.memory_space<vmem>>, vector<2x8x8xf32>,
    %58 = vector.extract_strided_slice %8 {offsets = [0, 0, 16], sizes = [2, 8, 8], strides = [1, 1, 1]} : vector<2x8x32xf32> to vector<2x8x8xf32>
    %59 = vector.extract_strided_slice %9 {offsets = [0, 0, 16], sizes = [2, 8, 8], strides = [1, 1, 1]} : vector<2x8x32xf32> to vector<2x8x8xf32>
    %60 = vector.extract_strided_slice %10 {offsets = [0, 0, 16], sizes = [2, 8, 8], strides = [1, 1, 1]} : vector<2x8x32xf32> to vector<2x8x8xf32>
    "tpu.trace_start"() <{level = 10 : i32, message = "bqd,bkd->bqk"}> : () -> ()
    %cst_35 = arith.constant dense<0.000000e+00> : vector<2x8x8xf32>
    %61 = tpu.matmul %58, %59, %cst_35 {dimension_numbers = #tpu.dot_dimension_numbers<[2], [2], [1], [1], [0, 0, 0, 1, 1, 1], [0], [0]>} : vector<2x8x8xf32>, vector<2x8x8xf32>, vector<2x8x8xf32> -> vector<2x8x8xf32>
    "tpu.trace_stop"() : () -> ()
    %cst_36 = arith.constant 2.500000e-01 : f32
    %62 = vector.broadcast %cst_36 : f32 to vector<2x8x8xf32>
    %63 = arith.mulf %61, %62 : vector<2x8x8xf32>
    %64 = arith.addf %63, %19 : vector<2x8x8xf32>
    %cst_37 = arith.constant dense<0xFF800000> : vector<2x8xf32>
    %65 = vector.multi_reduction <maximumf>, %64, %cst_37 [2] : vector<2x8x8xf32> to vector<2x8xf32>
    %66 = vector.shape_cast %65 : vector<2x8xf32> to vector<2x8x1xf32>
    %67 = vector.broadcast %66 : vector<2x8x1xf32> to vector<2x8x8xf32>
    %68 = arith.subf %64, %67 : vector<2x8x8xf32>
    %69 = math.exp %68 : vector<2x8x8xf32>
    %cst_38 = arith.constant dense<0.000000e+00> : vector<2x8xf32>
    %70 = vector.multi_reduction <add>, %69, %cst_38 [2] : vector<2x8x8xf32> to vector<2x8xf32>
    %71 = vector.shape_cast %70 : vector<2x8xf32> to vector<2x8x1xf32>
    %72 = tpu.reciprocal %71 : vector<2x8x1xf32> -> vector<2x8x1xf32>
    "tpu.trace_start"() <{level = 10 : i32, message = "bqk,bkd->bqd"}> : () -> ()
    %cst_39 = arith.constant dense<0.000000e+00> : vector<2x8x8xf32>
    %73 = tpu.matmul %69, %60, %cst_39 {dimension_numbers = #tpu.dot_dimension_numbers<[2], [1], [1], [2], [0, 0, 0, 1, 1, 2], [0], [0]>} : vector<2x8x8xf32>, vector<2x8x8xf32>, vector<2x8x8xf32> -> vector<2x8x8xf32>
    "tpu.trace_stop"() : () -> ()
    %74 = vector.broadcast %72 : vector<2x8x1xf32> to vector<2x8x8xf32>
    %75 = arith.mulf %73, %74 : vector<2x8x8xf32>
    %c0_40 = arith.constant 0 : index
    %c0_41 = arith.constant 0 : index
    %c16 = arith.constant 16 : index
    %76 = vector.load %arg8[%c0_40, %c0_41, %c16] : memref<2x8x32xf32, #tpu.memory_space<vmem>>, vector<2x8x8xf32>
    tpu.vector_store %arg8[%c0_40, %c0_41, %c16], %75 {strides = array<i32>} : memref<2x8x32xf32, #tpu.memory_space<vmem>>, vector<2x8x8xf32>,
    %77 = vector.extract_strided_slice %8 {offsets = [0, 0, 24], sizes = [2, 8, 8], strides = [1, 1, 1]} : vector<2x8x32xf32> to vector<2x8x8xf32>
    %78 = vector.extract_strided_slice %9 {offsets = [0, 0, 24], sizes = [2, 8, 8], strides = [1, 1, 1]} : vector<2x8x32xf32> to vector<2x8x8xf32>
    %79 = vector.extract_strided_slice %10 {offsets = [0, 0, 24], sizes = [2, 8, 8], strides = [1, 1, 1]} : vector<2x8x32xf32> to vector<2x8x8xf32>
    "tpu.trace_start"() <{level = 10 : i32, message = "bqd,bkd->bqk"}> : () -> ()
    %cst_42 = arith.constant dense<0.000000e+00> : vector<2x8x8xf32>
    %80 = tpu.matmul %77, %78, %cst_42 {dimension_numbers = #tpu.dot_dimension_numbers<[2], [2], [1], [1], [0, 0, 0, 1, 1, 1], [0], [0]>} : vector<2x8x8xf32>, vector<2x8x8xf32>, vector<2x8x8xf32> -> vector<2x8x8xf32>
    "tpu.trace_stop"() : () -> ()
    %cst_43 = arith.constant 2.500000e-01 : f32
    %81 = vector.broadcast %cst_43 : f32 to vector<2x8x8xf32>
    %82 = arith.mulf %80, %81 : vector<2x8x8xf32>
    %83 = arith.addf %82, %19 : vector<2x8x8xf32>
    %cst_44 = arith.constant dense<0xFF800000> : vector<2x8xf32>
    %84 = vector.multi_reduction <maximumf>, %83, %cst_44 [2] : vector<2x8x8xf32> to vector<2x8xf32>
    %85 = vector.shape_cast %84 : vector<2x8xf32> to vector<2x8x1xf32>
    %86 = vector.broadcast %85 : vector<2x8x1xf32> to vector<2x8x8xf32>
    %87 = arith.subf %83, %86 : vector<2x8x8xf32>
    %88 = math.exp %87 : vector<2x8x8xf32>
    %cst_45 = arith.constant dense<0.000000e+00> : vector<2x8xf32>
    %89 = vector.multi_reduction <add>, %88, %cst_45 [2] : vector<2x8x8xf32> to vector<2x8xf32>
    %90 = vector.shape_cast %89 : vector<2x8xf32> to vector<2x8x1xf32>
    %91 = tpu.reciprocal %90 : vector<2x8x1xf32> -> vector<2x8x1xf32>
    "tpu.trace_start"() <{level = 10 : i32, message = "bqk,bkd->bqd"}> : () -> ()
    %cst_46 = arith.constant dense<0.000000e+00> : vector<2x8x8xf32>
    %92 = tpu.matmul %88, %79, %cst_46 {dimension_numbers = #tpu.dot_dimension_numbers<[2], [1], [1], [2], [0, 0, 0, 1, 1, 2], [0], [0]>} : vector<2x8x8xf32>, vector<2x8x8xf32>, vector<2x8x8xf32> -> vector<2x8x8xf32>
    "tpu.trace_stop"() : () -> ()
    %93 = vector.broadcast %91 : vector<2x8x1xf32> to vector<2x8x8xf32>
    %94 = arith.mulf %92, %93 : vector<2x8x8xf32>
    %c0_47 = arith.constant 0 : index
    %c0_48 = arith.constant 0 : index
    %c24 = arith.constant 24 : index
    %95 = vector.load %arg8[%c0_47, %c0_48, %c24] : memref<2x8x32xf32, #tpu.memory_space<vmem>>, vector<2x8x8xf32>
    tpu.vector_store %arg8[%c0_47, %c0_48, %c24], %94 {strides = array<i32>} : memref<2x8x32xf32, #tpu.memory_space<vmem>>, vector<2x8x8xf32>,
    %c0_49 = arith.constant 0 : index
    %c0_50 = arith.constant 0 : index
    %c0_51 = arith.constant 0 : index
    %96 = vector.load %arg8[%c0_49, %c0_50, %c0_51] : memref<2x8x32xf32, #tpu.memory_space<vmem>>, vector<2x8x32xf32>
    %c0_52 = arith.constant 0 : index
    %c0_53 = arith.constant 0 : index
    %c0_54 = arith.constant 0 : index
    %97 = vector.load %arg1[%c0_52, %c0_53, %c0_54] : memref<2x8x32xf32, #tpu.memory_space<vmem>>, vector<2x8x32xf32>
    %98 = arith.addf %96, %97 : vector<2x8x32xf32>
    %c0_55 = arith.constant 0 : index
    %c0_56 = arith.constant 0 : index
    %c0_57 = arith.constant 0 : index
    %99 = vector.load %arg7[%c0_55, %c0_56, %c0_57] : memref<2x8x32xf32, #tpu.memory_space<vmem>>, vector<2x8x32xf32>
    tpu.vector_store %arg7[%c0_55, %c0_56, %c0_57], %98 {strides = array<i32>} : memref<2x8x32xf32, #tpu.memory_space<vmem>>, vector<2x8x32xf32>,
    return
  }
  func.func @transform_0(%arg0: i32) -> (i32, i32, i32) {
    %c0_i32 = arith.constant 0 : i32
    %c0_i32_0 = arith.constant 0 : i32
    %c0_i32_1 = arith.constant 0 : i32
    return %arg0, %c0_i32, %c0_i32_0 : i32, i32, i32
  }
  func.func @transform_1(%arg0: i32) -> (i32, i32) {
    %c0_i32 = arith.constant 0 : i32
    %c0_i32_0 = arith.constant 0 : i32
    %c0_i32_1 = arith.constant 0 : i32
    return %c0_i32, %c0_i32_0 : i32, i32
  }
  func.func @transform_2(%arg0: i32) -> (i32, i32) {
    %c0_i32 = arith.constant 0 : i32
    %c0_i32_0 = arith.constant 0 : i32
    %c0_i32_1 = arith.constant 0 : i32
    return %c0_i32, %c0_i32_0 : i32, i32
  }
  func.func @transform_3(%arg0: i32) -> (i32, i32) {
    %c0_i32 = arith.constant 0 : i32
    %c0_i32_0 = arith.constant 0 : i32
    %c0_i32_1 = arith.constant 0 : i32
    return %c0_i32, %c0_i32_0 : i32, i32
  }
  func.func @transform_4(%arg0: i32) -> (i32, i32, i32, i32) {
    %c0_i32 = arith.constant 0 : i32
    %c0_i32_0 = arith.constant 0 : i32
    %c0_i32_1 = arith.constant 0 : i32
    %c0_i32_2 = arith.constant 0 : i32
    return %c0_i32, %arg0, %c0_i32_0, %c0_i32_1 : i32, i32, i32, i32
  }
  func.func @transform_5(%arg0: i32) -> (i32, i32, i32, i32) {
    %c0_i32 = arith.constant 0 : i32
    %c0_i32_0 = arith.constant 0 : i32
    %c0_i32_1 = arith.constant 0 : i32
    %c0_i32_2 = arith.constant 0 : i32
    return %c0_i32, %arg0, %c0_i32_0, %c0_i32_1 : i32, i32, i32, i32
  }
  func.func @transform_6(%arg0: i32) -> (i32, i32, i32) {
    %c0_i32 = arith.constant 0 : i32
    %c0_i32_0 = arith.constant 0 : i32
    %c0_i32_1 = arith.constant 0 : i32
    return %arg0, %c0_i32, %c0_i32_0 : i32, i32, i32
  }
}

</mosaic_0001>

<bundles_post_ra>
// kernel: tpu_custom_call.1
= control target key start
LH: loop header
LB: loop body
LE: loop exit
PB: predicated region body
PF: predicated region fallthrough
CT: control target
= control target key end

     0   :  { %11 = vsyncpa [#allocation4], 0  ;;  %s1378_s0 = inlined_call_operand.hbm [shape: f32[2,8,32], index: 0, kind: input, shape index: {}]   ;;  %s1379_s1 = inlined_call_operand.hbm [shape: f32[32,32], index: 1, kind: input, shape index: {}]   ;;  %s1380_s2 = inlined_call_operand.hbm [shape: f32[32,32], index: 2, kind: input, shape index: {}]   ;;  %s1381_s3 = inlined_call_operand.hbm [shape: f32[32,32], index: 3, kind: input, shape index: {}]   ;;  %s1382_s4 = inlined_call_operand.hbm [shape: f32[1,2,8,8], index: 4, kind: input, shape index: {}]   ;;  %s1383_s5 = inlined_call_operand.vmem [shape: s8[1,2,8,8], index: 5, kind: input, shape index: {}]   ;;  %s1384_s6 = inlined_call_operand.hbm [shape: f32[2,8,32], index: 6, kind: output, shape index: {}]  }
   0x1   :  { %12 = vsyncpa [#allocation7], 0 }
   0x2   :  { %13 = vsyncpa [#allocation10], 0 }
   0x3   :  { %14 = vsyncpa [#allocation5], 0  ;;  %s32_s23 = sshll.u32 %s1379_s1, 4  ;;  %s1142_s24 = smov [#allocation6]   ;;  %s33_s23 = int_to_ptr.hbm [resolvable:$true] %s32_s23 }
   0x4   :  { %s34_s25 = sshll.u32 %s1142_s24, 4  ;;  %s58_s28 = sshll.u32 %s1381_s3, 4  ;;  %s35_s25 = int_to_ptr.vmem [resolvable:$true] %s34_s25  ;;  %s59_s28 = int_to_ptr.hbm [resolvable:$true] %s58_s28 }
   0x5   :  { %s1143_s29 = smov 128   ;;  %s1144_s30 = smov 8  }
   0x6   :  { %40 = dma.hbm_to_vmem [thread:$0]  %s33_s23, 512, %s35_s25, [#allocation7], %s1143_s29, %s1143_s29, %s1144_s30  }
   0x7   :  { %s1145_s7 = smov [#allocation9]   ;;  %s19_s1 = sshll.u32 %s1378_s0, 4  ;;  %s20_s1 = int_to_ptr.hbm [resolvable:$true] %s19_s1 }
   0x8   :  { %s60_s8 = sshll.u32 %s1145_s7, 4  ;;  %s45_s12 = sshll.u32 %s1380_s2, 4  ;;  %s61_s8 = int_to_ptr.vmem [resolvable:$true] %s60_s8  ;;  %s46_s12 = int_to_ptr.hbm [resolvable:$true] %s45_s12 }
   0x9   :  { %66 = dma.hbm_to_vmem [thread:$0]  %s59_s28, 512, %s61_s8, [#allocation10], %s1143_s29, %s1143_s29, %s1144_s30  }
   0xa   :  { %s1146_s13 = smov [#allocation3]   ;;  %s1147_s15 = smov [#allocation8]  }
   0xb   :  { %s21_s14 = sshll.u32 %s1146_s13, 4  ;;  %s47_s0 = sshll.u32 %s1147_s15, 4  ;;  %s22_s14 = int_to_ptr.vmem [resolvable:$true] %s21_s14  ;;  %s48_s0 = int_to_ptr.vmem [resolvable:$true] %s47_s0 }
   0xc   :  { %27 = dma.hbm_to_vmem [thread:$0]  %s20_s1, 256, %s22_s14, [#allocation4], %s1143_s29, %s1143_s29, %s1144_s30  }
   0xd   :  { %s71_s18 = sshll.u32 %s1382_s4, 4  ;;  %s1148_s2 = smov [#allocation11]   ;;  %s72_s18 = int_to_ptr.hbm [resolvable:$true] %s71_s18 }
   0xe   :  { %53 = dma.hbm_to_vmem [thread:$0]  %s46_s12, 512, %s48_s0, [#allocation7], %s1143_s29, %s1143_s29, %s1144_s30  }
   0xf   :  { %s73_s19 = sshll.u32 %s1148_s2, 4  ;;  %s74_s19 = int_to_ptr.vmem [resolvable:$true] %s73_s19 }
  0x10   :  { %79 = dma.hbm_to_vmem [thread:$0]  %s72_s18, 256, %s74_s19, [#allocation10], %s1143_s29, %s1143_s29, %s1144_s30  }
  0x11   :  { %1134 = dma.done.wait [#allocation4], 256  }
  0x12   :  { %1135 = vsyncadd [#allocation4], 4294967040 }
  0x13   :  { %1136 = dma.done.wait [#allocation7], 1024  }
  0x14   :  { %1137 = vsyncadd [#allocation7], 4294966272 }
  0x15   :  { %1138 = dma.done.wait [#allocation10], 768  }
  0x16   :  { %1139 = vsyncadd [#allocation10], 4294966528  ;;  %v107_v0 = vld [vmem:[#allocation6 + $0x18] sm:$0xff]  ;;  %v106_v2 = vld [vmem:[#allocation6 + $0x10] sm:$0xff]  ;;  %vm108_vm0 = vcmask 261120   ;;  %vm204_vm1 = vcmask 64512  }
  0x17   :  { %v141_v1 = vld [vmem:[#allocation8 + $0x18] sm:$0xff]  ;;  %127 = vmatpush.msra.mxu0 %v107_v0  ;;  %v140_v3 = vld [vmem:[#allocation8 + $0x10] sm:$0xff]  ;;  %v105_v4 = vld [vmem:[#allocation6 + $0x8] sm:$0xff]  ;;  %s1149_s4 = smov 112   ;;  %s1150_s20 = smov 120  }
  0x18   :  { %154 = vmatpush.msra.mxu1 %v141_v1  ;;  %v139_v5 = vld [vmem:[#allocation8 + $0x8] sm:$0xff]  ;;  %v168_v6 = vld [vmem:[#allocation9 + $0x18] sm:$0xff]  ;;  %v167_v7 = vld [vmem:[#allocation9 + $0x10] sm:$0xff]  ;;  %s1151_s21 = smov 104   ;;  %s1153_s24 = smov 24  }
  0x19   :  { %128 = vmatpush.msra.mxu0 %v106_v2  ;;  %v104_v8 = vld [vmem:[#allocation6] sm:$0xff]  ;;  %181 = vmatpush.msra.mxu2 %v168_v6  ;;  %v1220_v10 = vld [vmem:[#allocation3] sm:$0xff]  ;;  %v166_v11 = vld [vmem:[#allocation9 + $0x8] sm:$0xff]  ;;  %s1154_s25 = smov [#allocation12]   ;;  %s886_s7 = sshll.u32 %s1384_s6, 4  ;;  %s887_s7 = int_to_ptr.hbm [resolvable:$true] %s886_s7 }
  0x1a   :  { %155 = vmatpush.msra.mxu1 %v140_v3  ;;  %v138_v9 = vld [vmem:[#allocation8] sm:$0xff]  ;;  %v1228_v13 = vld [vmem:[#allocation3 + $0x8] sm:$0xff]  ;;  %v201_v43 = vld [vmem:[#allocation11 + $0x8] sm:$0xff]  ;;  %s884_s26 = sshll.u32 %s1154_s25, 4  ;;  %s885_s26 = int_to_ptr.vmem [resolvable:$true] %s884_s26 }
  0x1b   :  { %129 = vmatpush.msra.mxu0 %v105_v4  ;;  %182 = vmatpush.msra.mxu2 %v167_v7  ;;  %v165_v12 = vld [vmem:[#allocation9] sm:$0xff] }
  0x1c   :  { %156 = vmatpush.msra.mxu1 %v139_v5  ;;  %v932_v26 = vld [vmem:[%s1383_s5] sm:$0xf]   ;;  %s1152_s5 = smov 16  }
  0x1d   :  { %130 = vmatpush.msra.mxu0 %v104_v8  ;;  %183 = vmatpush.msra.mxu2 %v166_v11  ;;  %v933_v29 = vunpack.c.0.s8 %v932_v26  ;;  %v200_v33 = vld [vmem:[#allocation11] sm:$0xff]  ;;  %v934_v34 = vunpack.c.1.s8 %v932_v26 }
  0x1e   :  { %157 = vmatpush.msra.mxu1 %v138_v9  ;;  %901 = vmatmul.msk.f32.vlgmr.msra.gmra.mxu0 %vm108_vm0, %v1220_v10 }
  0x1f   :  { %903 = vmatmul.msk.f32.vlgmr.msra.gmra.mxu1 %vm108_vm0, %v1220_v10  ;;  %184 = vmatpush.msra.mxu2 %v165_v12  ;;  %v196_v30 = vcvt.s32.f32 %v933_v29  ;;  %v197_v38 = vcvt.s32.f32 %v934_v34 }
  0x20   :  { %905 = vmatmul.msk.f32.vlgmr.msra.gmra.mxu2 %vm108_vm0, %v1220_v10 }
  0x21   :  { %vm198_vm2 = vcmp.gt.f32.partialorder %v196_v30, 0.0  ;;  %vm199_vm3 = vcmp.gt.f32.partialorder %v197_v38, 0.0 }
  0x22   :  { %v202_v36 = vsel %vm198_vm2, -1e+30, %v200_v33  ;;  %v203_v46 = vsel %vm199_vm3, -1e+30, %v201_v43 }
  0x26   :  { %902 = vmatmul.msk.f32.gmra.mxu0 %vm108_vm0, %v1228_v13 }
  0x27   :  { %904 = vmatmul.msk.f32.gmra.mxu1 %vm108_vm0, %v1228_v13 }
  0x28   :  { %906 = vmatmul.msk.f32.gmra.mxu2 %vm108_vm0, %v1228_v13 }
  0x9b   :  { %v132_v14 = vpop.f32.mrf.mxu0 }
  0x9c   :  { %v159_v15 = vpop.f32.mrf.mxu1  ;;  %357 = vrot.lane.b32.xlu1 %v132_v14, %s1150_s20 }
  0x9d   :  { %532 = vrot.lane.b32.xlu2 %v159_v15, %s1149_s4  ;;  %359 = vrot.lane.b32.xlu0 %v159_v15, %s1150_s20 }
  0x9e   :  { %907 = vmatpush.xpose.msk.msra.mxu3 %vm204_vm1, %v159_v15 }
  0xa1   :  { %908 = vmatmul.msk.f32.vlgmr.msra.gmra.mxu3 %vm204_vm1, %v132_v14 }
  0xa3   :  { %v135_v16 = vpop.f32.mrf.mxu0  ;;  %v1248_v18 = vpop.f32.mrf.mxu2 }
  0xa4   :  { %v162_v17 = vpop.f32.mrf.mxu1  ;;  %385 = vrot.lane.b32.xlu1 %v135_v16, %s1150_s20 }
  0xa5   :  { %560 = vrot.lane.b32.xlu2 %v162_v17, %s1149_s4  ;;  %387 = vrot.lane.b32.xlu0 %v162_v17, %s1150_s20 }
  0xa6   :  { %909 = vmatpush.xpose.msk.msrb.mxu3 %vm204_vm1, %v162_v17 }
  0xa9   :  { %910 = vmatmul.msk.f32.vlgmr.msrb.gmra.mxu3 %vm204_vm1, %v135_v16 }
  0xaa   :  { %325 = vmatpush.msra.mxu3 %v1248_v18 }
  0xab   :  { %v189_v19 = vpop.f32.mrf.mxu2 }
  0xac   :  { %558 = vrot.lane.b32.xlu1 %v135_v16, %s1149_s4  ;;  %348 = vmatpush.msrb.mxu0 %v189_v19  ;;  %v1252_v20 = vpack.i.bf16 %v189_v19, %v1248_v18 }
  0xad   :  { %703 = vrot.lane.b32.xlu2 %v159_v15, %s1151_s21  ;;  %530 = vrot.lane.b32.xlu0 %v132_v14, %s1149_s4 }
  0xb4   :  { %701 = vrot.lane.b32.xlu1 %v132_v14, %s1151_s21 }
  0xb5   :  { %731 = vrot.lane.b32.xlu0 %v162_v17, %s1151_s21  ;;  %729 = vrot.lane.b32.xlu2 %v135_v16, %s1151_s21 }
  0xbc   :  { %949 = vrot.lane.b32.xlu1 %v1252_v20, %s1150_s20 }
  0xf7   :  { %v533_v21 = vpop.permute.xlu2 %532 }
  0xff   :  { %v561_v22 = vpop.permute.xlu2 %560 }
 0x107   :  { %v704_v25 = vpop.permute.xlu2 %703 }
 0x10e   :  { %v358_v24 = vpop.permute.xlu1 %357 }
 0x10f   :  { %v360_v23 = vpop.permute.xlu0 %359  ;;  %v730_v44 = vpop.permute.xlu2 %729 }
 0x110   :  { %913 = vmatpush.xpose.msk.msrb.mxu1 %vm204_vm1, %v360_v23 }
 0x113   :  { %914 = vmatmul.msk.f32.vlgmr.msrb.gmra.mxu1 %vm204_vm1, %v358_v24 }
 0x114   :  { %919 = vmatpush.xpose.msk.msra.mxu1 %vm204_vm1, %v533_v21 }
 0x116   :  { %v386_v28 = vpop.permute.xlu1 %385 }
 0x117   :  { %v388_v27 = vpop.permute.xlu0 %387 }
 0x118   :  { %925 = vmatpush.xpose.msk.msrb.mxu1 %vm204_vm1, %v704_v25  ;;  %915 = vmatpush.xpose.msk.msrb.mxu2 %vm204_vm1, %v388_v27 }
 0x11b   :  { %916 = vmatmul.msk.f32.vlgmr.msrb.gmra.mxu2 %vm204_vm1, %v386_v28 }
 0x11c   :  { %921 = vmatpush.xpose.msk.msra.mxu2 %vm204_vm1, %v561_v22 }
 0x11e   :  { %v559_v32 = vpop.permute.xlu1 %558 }
 0x11f   :  { %v531_v31 = vpop.permute.xlu0 %530 }
 0x120   :  { %920 = vmatmul.msk.f32.vlgmr.msra.gmra.mxu1 %vm204_vm1, %v531_v31 }
 0x123   :  { %922 = vmatmul.msk.f32.vlgmr.msra.gmra.mxu2 %vm204_vm1, %v559_v32 }
 0x124   :  { %v228_v35 = vpop.f32.mrf.mxu3 }
 0x125   :  { %v257_v37 = vmul.f32 0.25, %v228_v35 }
 0x126   :  { %v702_v41 = vpop.permute.xlu1 %701 }
 0x127   :  { %v732_v39 = vpop.permute.xlu0 %731  ;;  %v259_v40 = vadd.f32 %v257_v37, %v202_v36 }
 0x128   :  { %927 = vmatpush.xpose.msk.msrb.mxu2 %vm204_vm1, %v732_v39  ;;  %926 = vmatmul.msk.f32.vlgmr.msrb.gmra.mxu1 %vm204_vm1, %v702_v41 }
 0x129   :  { %v261_v42 = vsel %vm204_vm1, %v259_v40, -inf }
 0x12a   :  { %262 = vmax.xlane.f32.xlu0 %v261_v42 }
 0x12b   :  { %928 = vmatmul.msk.f32.vlgmr.msrb.gmra.mxu2 %vm204_vm1, %v730_v44 }
 0x12c   :  { %v254_v45 = vpop.f32.mrf.mxu3 }
 0x12d   :  { %v258_v47 = vmul.f32 0.25, %v254_v45 }
 0x12e   :  { %v950_v50 = vpop.permute.xlu1 %949 }
 0x12f   :  { %v260_v48 = vadd.f32 %v258_v47, %v203_v46  ;;  %v952_v51 = vunpack.i.h.bf16 %v950_v50  ;;  %v951_v52 = vunpack.i.l.bf16 %v950_v50 }
 0x131   :  { %v264_v49 = vsel %vm204_vm1, %v260_v48, -inf  ;;  %485 = vmatpush.msrb.mxu3 %v951_v52  ;;  %512 = vmatpush.msra.mxu0 %v952_v51 }
 0x132   :  { %265 = vmax.xlane.f32.xlu1 %v264_v49 }
 0x14b   :  { %833 = vrot.lane.b32.xlu1 %v189_v19, %s1151_s21 }
 0x190   :  { %v382_v53 = vpop.f32.mrf.mxu1 }
 0x191   :  { %v413_v54 = vmul.f32 0.25, %v382_v53 }
 0x193   :  { %v415_v55 = vadd.f32 %v413_v54, %v202_v36 }
 0x195   :  { %v417_v56 = vsel %vm204_vm1, %v415_v55, -inf }
 0x196   :  { %418 = vmax.xlane.f32.xlu2 %v417_v56 }
 0x19d   :  { %v263_v57 = vpop.xlane.xlu0 %262  ;;  %v555_v58 = vpop.f32.mrf.mxu1 }
 0x19e   :  { %v267_v59 = vsub.f32 %v259_v40, %v263_v57  ;;  %v586_v60 = vmul.f32 0.25, %v555_v58  ;;  %v410_v61 = vpop.f32.mrf.mxu2 }
 0x19f   :  { %v414_v62 = vmul.f32 0.25, %v410_v61 }
 0x1a0   :  { %v269_v63 = vmul.f32 1.442695, %v267_v59  ;;  %v588_v0 = vadd.f32 %v586_v60, %v202_v36 }
 0x1a1   :  { %v416_v1 = vadd.f32 %v414_v62, %v203_v46 }
 0x1a2   :  { %958 = vpow2.f32 %v269_v63  ;;  %v590_v2 = vsel %vm204_vm1, %v588_v0, -inf }
 0x1a3   :  { %591 = vmax.xlane.f32.xlu0 %v590_v2  ;;  %v420_v3 = vsel %vm204_vm1, %v416_v1, -inf }
 0x1a4   :  { %421 = vmax.xlane.f32.xlu2 %v420_v3 }
 0x1a5   :  { %v266_v4 = vpop.xlane.xlu1 %265  ;;  %v726_v6 = vpop.f32.mrf.mxu1 }
 0x1a6   :  { %v268_v5 = vsub.f32 %v260_v48, %v266_v4  ;;  %v583_v7 = vpop.f32.mrf.mxu2  ;;  %v757_v8 = vmul.f32 0.25, %v726_v6 }
 0x1a7   :  { %v587_v9 = vmul.f32 0.25, %v583_v7 }
 0x1a8   :  { %v959_v11 = vpop.eup %958  ;;  %v271_v12 = vmul.f32 1.442695, %v268_v5  ;;  %v759_v14 = vadd.f32 %v757_v8, %v202_v36 }
 0x1a9   :  { %911 = vmatmul.msk.f32.vlgmr.msra.gmra.mxu3 %vm204_vm1, %v959_v11  ;;  %v589_v15 = vadd.f32 %v587_v9, %v203_v46  ;;  %v273_v51 = vsel %vm204_vm1, %v959_v11, 0.0 }
 0x1aa   :  { %960 = vpow2.f32 %v271_v12  ;;  %v761_v16 = vsel %vm204_vm1, %v759_v14, -inf }
 0x1ab   :  { %v593_v17 = vsel %vm204_vm1, %v589_v15, -inf  ;;  %762 = vmax.xlane.f32.xlu0 %v761_v16 }
 0x1ac   :  { %594 = vmax.xlane.f32.xlu2 %v593_v17 }
 0x1ae   :  { %v754_v19 = vpop.f32.mrf.mxu2 }
 0x1af   :  { %v758_v21 = vmul.f32 0.25, %v754_v19 }
 0x1b0   :  { %v961_v22 = vpop.eup %960 }
 0x1b1   :  { %v760_v23 = vadd.f32 %v758_v21, %v203_v46  ;;  %912 = vmatmul.msk.f32.vlgmr.msrb.gmra.mxu0 %vm204_vm1, %v961_v22  ;;  %v276_v58 = vsel %vm204_vm1, %v961_v22, 0.0 }
 0x1b3   :  { %v764_v24 = vsel %vm204_vm1, %v760_v23, -inf }
 0x1b4   :  { %765 = vmax.xlane.f32.xlu0 %v764_v24 }
 0x1bd   :  { %v834_v54 = vpop.permute.xlu1 %833 }
 0x1c4   :  { %954 = vrot.lane.b32.xlu2 %v1252_v20, %s1149_s4 }
 0x1c8   :  { %807 = vrot.lane.b32.xlu0 %v1248_v18, %s1151_s21 }
 0x209   :  { %v419_v25 = vpop.xlane.xlu2 %418 }
 0x20a   :  { %v423_v26 = vsub.f32 %v415_v55, %v419_v25 }
 0x20c   :  { %v425_v27 = vmul.f32 1.442695, %v423_v26 }
 0x20e   :  { %962 = vpow2.f32 %v425_v27 }
 0x214   :  { %v963_v28 = vpop.eup %962 }
 0x215   :  { %917 = vmatmul.msk.f32.vlgmr.msrb.gmra.mxu3 %vm204_vm1, %v963_v28  ;;  %v429_v29 = vsel %vm204_vm1, %v963_v28, 0.0 }
 0x216   :  { %v592_v30 = vpop.xlane.xlu0 %591  ;;  %430 = vadd.xlane.f32.xlu1 %v429_v29 }
 0x217   :  { %v596_v31 = vsub.f32 %v588_v0, %v592_v30  ;;  %v422_v32 = vpop.xlane.xlu2 %421 }
 0x218   :  { %v424_v33 = vsub.f32 %v416_v1, %v422_v32 }
 0x219   :  { %v598_v34 = vmul.f32 1.442695, %v596_v31 }
 0x21a   :  { %v427_v35 = vmul.f32 1.442695, %v424_v33 }
 0x21b   :  { %964 = vpow2.f32 %v598_v34 }
 0x21c   :  { %966 = vpow2.f32 %v427_v35 }
 0x21e   :  { %v763_v20 = vpop.xlane.xlu0 %762 }
 0x21f   :  { %v595_v18 = vpop.xlane.xlu2 %594  ;;  %v767_v36 = vsub.f32 %v759_v14, %v763_v20 }
 0x220   :  { %v597_v37 = vsub.f32 %v589_v15, %v595_v18 }
 0x221   :  { %v965_v38 = vpop.eup %964  ;;  %v769_v40 = vmul.f32 1.442695, %v767_v36 }
 0x222   :  { %v967_v39 = vpop.eup %966  ;;  %v600_v41 = vmul.f32 1.442695, %v597_v37  ;;  %v602_v42 = vsel %vm204_vm1, %v965_v38, 0.0 }
 0x223   :  { %603 = vadd.xlane.f32.xlu0 %v602_v42  ;;  %918 = vmatmul.msk.f32.vlgmr.msra.gmra.mxu0 %vm204_vm1, %v967_v39  ;;  %v432_v43 = vsel %vm204_vm1, %v967_v39, 0.0  ;;  %968 = vpow2.f32 %v769_v40 }
 0x224   :  { %433 = vadd.xlane.f32.xlu2 %v432_v43  ;;  %970 = vpow2.f32 %v600_v41 }
 0x227   :  { %v955_v44 = vpop.permute.xlu2 %954  ;;  %v766_v45 = vpop.xlane.xlu0 %765 }
 0x228   :  { %v957_v46 = vunpack.i.h.bf16 %v955_v44  ;;  %v956_v47 = vunpack.i.l.bf16 %v955_v44  ;;  %v768_v48 = vsub.f32 %v760_v23, %v766_v45 }
 0x229   :  { %v969_v49 = vpop.eup %968 }
 0x22a   :  { %v771_v50 = vmul.f32 1.442695, %v768_v48  ;;  %657 = vmatpush.msra.mxu3 %v956_v47  ;;  %683 = vmatpush.msrb.mxu0 %v957_v46  ;;  %v971_v52 = vpop.eup %970  ;;  %v773_v53 = vsel %vm204_vm1, %v969_v49, 0.0 }
 0x22b   :  { %274 = vadd.xlane.f32.xlu0 %v273_v51  ;;  %923 = vmatmul.msk.f32.vlgmr.msra.gmra.mxu3 %vm204_vm1, %v965_v38  ;;  %v605_v55 = vsel %vm204_vm1, %v971_v52, 0.0 }
 0x22c   :  { %972 = vpow2.f32 %v771_v50  ;;  %924 = vmatmul.msk.f32.vlgmr.msrb.gmra.mxu0 %vm204_vm1, %v971_v52  ;;  %774 = vadd.xlane.f32.xlu2 %v773_v53  ;;  %v1299_v63 = vpop.f32.mrf.mxu3 }
 0x22d   :  { %854 = vmatpush.msra.mxu0 %v834_v54  ;;  %606 = vadd.xlane.f32.xlu1 %v605_v55 }
 0x22e   :  { %v1307_v16 = vpop.f32.mrf.mxu0 }
 0x232   :  { %v973_v56 = vpop.eup %972 }
 0x233   :  { %v776_v57 = vsel %vm204_vm1, %v973_v56, 0.0 }
 0x234   :  { %930 = vmatmul.msk.f32.vlgmr.msra.gmra.mxu0 %vm204_vm1, %v973_v56  ;;  %277 = vadd.xlane.f32.xlu2 %v276_v58 }
 0x235   :  { %777 = vadd.xlane.f32.xlu1 %v776_v57 }
 0x23a   :  { %v808_v59 = vpop.permute.xlu0 %807 }
 0x23b   :  { %828 = vmatpush.msrb.mxu3 %v808_v59 }
 0x23c   :  { %929 = vmatmul.msk.f32.vlgmr.msrb.gmra.mxu3 %vm204_vm1, %v969_v49 }
 0x289   :  { %v431_v60 = vpop.xlane.xlu1 %430 }
 0x28a   :  { %974 = vrcp.f32 %v431_v60  ;;  %v446_v1 = vand.u32 2147483648, %v431_v60  ;;  %v444_v3 = vand.u32 2147483647, %v431_v60  ;;  %vm440_vm5 = vweird.f32 %v431_v60 }
 0x28c   :  { %v447_v7 = vor.u32 1.1754944e-38, %v446_v1  ;;  %vm445_vm7 = vcmp.eq.f32.partialorder %v444_v3, 8.507059e+37 }
 0x290   :  { %v975_v61 = vpop.eup %974 }
 0x291   :  { %v436_v62 = vmul.f32 %v975_v61, %v431_v60  ;;  %vm441_vm4 = vweird.f32 %v975_v61 }
 0x292   :  { %vm442_vm6 = vmor %vm440_vm5, %vm441_vm4 }
 0x293   :  { %v437_v0 = vsub.f32 1.0, %v436_v62 }
 0x295   :  { %v438_v2 = vmul.f32 %v975_v61, %v437_v0 }
 0x296   :  { %v1301_v4 = vpop.xlane.xlu0 %603 }
 0x297   :  { %976 = vrcp.f32 %v1301_v4  ;;  %v434_v5 = vpop.xlane.xlu2 %433  ;;  %v439_v6 = vadd.f32 %v975_v61, %v438_v2  ;;  %v619_v32 = vand.u32 2147483648, %v1301_v4  ;;  %vm613_vm11 = vweird.f32 %v1301_v4 }
 0x298   :  { %978 = vrcp.f32 %v434_v5  ;;  %v487_v11 = vpop.f32.mrf.mxu3  ;;  %v458_v26 = vand.u32 2147483647, %v434_v5  ;;  %v460_v27 = vand.u32 2147483648, %v434_v5  ;;  %vm454_vm9 = vweird.f32 %v434_v5 }
 0x299   :  { %v443_v8 = vsel %vm442_vm6, %v975_v61, %v439_v6  ;;  %v617_v20 = vand.u32 2147483647, %v1301_v4  ;;  %v620_v47 = vor.u32 1.1754944e-38, %v619_v32 }
 0x29a   :  { %v448_v9 = vsel %vm445_vm7, %v447_v7, %v443_v8  ;;  %v461_v34 = vor.u32 1.1754944e-38, %v460_v27  ;;  %vm459_vm12 = vcmp.eq.f32.partialorder %v458_v26, 8.507059e+37 }
 0x29b   :  { %v517_v12 = vmul.f32 %v487_v11, %v448_v9  ;;  %vm618_vm6 = vcmp.eq.f32.partialorder %v617_v20, 8.507059e+37 }
 0x29d   :  { %v1304_v14 = vpop.eup %976  ;;  %521 = vrot.lane.b32.xlu1 %v517_v12, %s1144_s30 }
 0x29e   :  { %v979_v15 = vpop.eup %978  ;;  %v609_v17 = vmul.f32 %v1304_v14, %v1301_v4  ;;  %v275_v19 = vpop.xlane.xlu0 %274  ;;  %vm614_vm13 = vweird.f32 %v1304_v14 }
 0x29f   :  { %v450_v21 = vmul.f32 %v979_v15, %v434_v5  ;;  %980 = vrcp.f32 %v275_v19  ;;  %v1311_v22 = vpop.xlane.xlu2 %774  ;;  %vm455_vm8 = vweird.f32 %v979_v15  ;;  %v288_v44 = vand.u32 2147483647, %v275_v19  ;;  %vm1336_vm15 = vmor %vm613_vm11, %vm614_vm13 }
 0x2a0   :  { %v610_v23 = vsub.f32 1.0, %v609_v17  ;;  %v1313_v24 = vpop.xlane.xlu1 %606  ;;  %vm456_vm10 = vmor %vm454_vm9, %vm455_vm8  ;;  %v514_v35 = vpop.f32.mrf.mxu0  ;;  %v290_v45 = vand.u32 2147483648, %v275_v19  ;;  %vm284_vm2 = vweird.f32 %v275_v19 }
 0x2a1   :  { %v451_v25 = vsub.f32 1.0, %v450_v21  ;;  %982 = vrcp.f32 %v1313_v24  ;;  %v631_v51 = vand.u32 2147483647, %v1313_v24  ;;  %v633_v52 = vand.u32 2147483648, %v1313_v24 }
 0x2a2   :  { %984 = vrcp.f32 %v1311_v22  ;;  %v611_v29 = vmul.f32 %v1304_v14, %v610_v23  ;;  %vm289_vm5 = vcmp.eq.f32.partialorder %v288_v44, 8.507059e+37  ;;  %v291_v57 = vor.u32 1.1754944e-38, %v290_v45 }
 0x2a3   :  { %v452_v28 = vmul.f32 %v979_v15, %v451_v25  ;;  %vm627_vm7 = vweird.f32 %v1313_v24  ;;  %v634_v2 = vor.u32 1.1754944e-38, %v633_v52  ;;  %vm632_vm9 = vcmp.eq.f32.partialorder %v631_v51, 8.507059e+37 }
 0x2a4   :  { %v612_v38 = vadd.f32 %v1304_v14, %v611_v29 }
 0x2a5   :  { %v981_v30 = vpop.eup %980  ;;  %v453_v31 = vadd.f32 %v979_v15, %v452_v28 }
 0x2a6   :  { %v280_v33 = vmul.f32 %v981_v30, %v275_v19  ;;  %vm285_vm14 = vweird.f32 %v981_v30  ;;  %v616_v53 = vsel %vm1336_vm15, %v1304_v14, %v612_v38 }
 0x2a7   :  { %v983_v18 = vpop.eup %982  ;;  %v457_v36 = vsel %vm456_vm10, %v979_v15, %v453_v31  ;;  %v1321_v37 = vpop.xlane.xlu2 %277  ;;  %vm286_vm4 = vmor %vm284_vm2, %vm285_vm14  ;;  %v621_v61 = vsel %vm618_vm6, %v620_v47, %v616_v53 }
 0x2a8   :  { %v281_v39 = vsub.f32 1.0, %v280_v33  ;;  %v623_v40 = vmul.f32 %v983_v18, %v1313_v24  ;;  %v462_v41 = vsel %vm459_vm12, %v461_v34, %v457_v36  ;;  %986 = vrcp.f32 %v1321_v37  ;;  %v1327_v42 = vpop.xlane.xlu1 %777  ;;  %v1329_v43 = vpop.eup %984 }
 0x2a9   :  { %v518_v46 = vmul.f32 %v514_v35, %v462_v41  ;;  %988 = vrcp.f32 %v1327_v42  ;;  %v780_v55 = vmul.f32 %v1329_v43, %v1311_v22  ;;  %vm628_vm3 = vweird.f32 %v983_v18  ;;  %v685_v7 = vpop.f32.mrf.mxu0 }
 0x2aa   :  { %v282_v48 = vmul.f32 %v981_v30, %v281_v39  ;;  %v624_v49 = vsub.f32 1.0, %v623_v40  ;;  %vm629_vm8 = vmor %vm627_vm7, %vm628_vm3  ;;  %v304_v14 = vand.u32 2147483648, %v1321_v37  ;;  %v302_v19 = vand.u32 2147483647, %v1321_v37 }
 0x2ab   :  { %523 = vrot.lane.b32.xlu0 %v518_v46, %s1144_s30  ;;  %v781_v5 = vsub.f32 1.0, %v780_v55  ;;  %vm298_vm11 = vweird.f32 %v1321_v37  ;;  %v802_v26 = vand.u32 2147483647, %v1327_v42  ;;  %vm798_vm15 = vweird.f32 %v1327_v42 }
 0x2ac   :  { %v283_v54 = vadd.f32 %v981_v30, %v282_v48  ;;  %v625_v56 = vmul.f32 %v983_v18, %v624_v49  ;;  %v305_v27 = vor.u32 1.1754944e-38, %v304_v14  ;;  %vm303_vm14 = vcmp.eq.f32.partialorder %v302_v19, 8.507059e+37 }
 0x2ad   :  { %v782_v23 = vmul.f32 %v1329_v43, %v781_v5  ;;  %vm785_vm3 = vweird.f32 %v1329_v43  ;;  %v790_v34 = vand.u32 2147483648, %v1311_v22  ;;  %v788_v36 = vand.u32 2147483647, %v1311_v22 }
 0x2ae   :  { %v987_v58 = vpop.eup %986  ;;  %v287_v59 = vsel %vm286_vm4, %v981_v30, %v283_v54  ;;  %v626_v60 = vadd.f32 %v983_v18, %v625_v56  ;;  %v659_v62 = vpop.f32.mrf.mxu3  ;;  %vm803_vm4 = vcmp.eq.f32.partialorder %v802_v26, 8.507059e+37 }
 0x2af   :  { %v292_v0 = vsel %vm289_vm5, %v291_v57, %v287_v59  ;;  %v294_v1 = vmul.f32 %v987_v58, %v1321_v37  ;;  %v688_v3 = vmul.f32 %v659_v62, %v621_v61  ;;  %v989_v4 = vpop.eup %988  ;;  %vm299_vm10 = vweird.f32 %v987_v58 }
 0x2b0   :  { %v630_v6 = vsel %vm629_vm8, %v983_v18, %v626_v60  ;;  %v353_v8 = vmul.f32 %v1299_v63, %v292_v0  ;;  %v794_v11 = vmul.f32 %v989_v4, %v1327_v42  ;;  %v804_v63 = vand.u32 2147483648, %v1327_v42  ;;  %vm300_vm13 = vmor %vm298_vm11, %vm299_vm10 }
 0x2b1   :  { %v295_v9 = vsub.f32 1.0, %v294_v1  ;;  %v635_v12 = vsel %vm632_vm9, %v634_v2, %v630_v6  ;;  %692 = vrot.lane.b32.xlu2 %v688_v3, %s1152_s5  ;;  %vm799_vm12 = vweird.f32 %v989_v4  ;;  %v783_v32 = vadd.f32 %v1329_v43, %v782_v23  ;;  %v856_v18 = vpop.f32.mrf.mxu0 }
 0x2b2   :  { %v689_v15 = vmul.f32 %v685_v7, %v635_v12  ;;  %355 = vst.msk [vmem:[#allocation2] sm:$0xff] %vm204_vm1, %v353_v8  ;;  %v795_v21 = vsub.f32 1.0, %v794_v11  ;;  %vm800_vm2 = vmor %vm798_vm15, %vm799_vm12  ;;  %v805_v31 = vor.u32 1.1754944e-38, %v804_v63  ;;  %vm784_vm5 = vweird.f32 %v1311_v22 }
 0x2b3   :  { %v296_v17 = vmul.f32 %v987_v58, %v295_v9  ;;  %vm786_vm6 = vmor %vm784_vm5, %vm785_vm3  ;;  %v791_v39 = vor.u32 1.1754944e-38, %v790_v34  ;;  %vm789_vm7 = vcmp.eq.f32.partialorder %v788_v36, 8.507059e+37  ;;  %vm527_vm8 = vcmask 130112  }
 0x2b4   :  { %694 = vrot.lane.b32.xlu0 %v689_v15, %s1152_s5  ;;  %v796_v25 = vmul.f32 %v989_v4, %v795_v21  ;;  %v787_v38 = vsel %vm786_vm6, %v1329_v43, %v783_v32  ;;  %vm698_vm9 = vcmask 195712   ;;  %vm869_vm10 = vcmask 261312  }
 0x2b5   :  { %v297_v24 = vadd.f32 %v987_v58, %v296_v17  ;;  %v792_v40 = vsel %vm789_vm7, %v791_v39, %v787_v38 }
 0x2b6   :  { %v797_v29 = vadd.f32 %v989_v4, %v796_v25 }
 0x2b7   :  { %v301_v28 = vsel %vm300_vm13, %v987_v58, %v297_v24 }
 0x2b8   :  { %v306_v30 = vsel %vm303_vm14, %v305_v27, %v301_v28  ;;  %v801_v33 = vsel %vm800_vm2, %v989_v4, %v797_v29 }
 0x2b9   :  { %v354_v35 = vmul.f32 %v1307_v16, %v306_v30  ;;  %v806_v20 = vsel %vm803_vm4, %v805_v31, %v801_v33 }
 0x2ba   :  { %v860_v37 = vmul.f32 %v856_v18, %v806_v20 }
 0x2bb   :  { %356 = vst.msk [vmem:[#allocation2 + $0x8] sm:$0xff] %vm204_vm1, %v354_v35 }
 0x2bc   :  { %865 = vrot.lane.b32.xlu2 %v860_v37, %s1153_s24 }
 0x2bf   :  { %v830_v41 = vpop.f32.mrf.mxu3 }
 0x2c0   :  { %v859_v42 = vmul.f32 %v830_v41, %v792_v40 }
 0x2c2   :  { %863 = vrot.lane.b32.xlu1 %v859_v42, %s1153_s24 }
 0x30b   :  { %v693_v44 = vpop.permute.xlu2 %692 }
 0x30f   :  { %v522_v16 = vpop.permute.xlu1 %521 }
 0x310   :  { %528 = vst.msk [vmem:[#allocation2] sm:$0xff] %vm527_vm8, %v522_v16 }
 0x311   :  { %699 = vst.msk [vmem:[#allocation2] sm:$0xff] %vm698_vm9, %v693_v44 }
 0x316   :  { %v866_v46 = vpop.permute.xlu2 %865 }
 0x31d   :  { %v524_v22 = vpop.permute.xlu0 %523 }
 0x31e   :  { %529 = vst.msk [vmem:[#allocation2 + $0x8] sm:$0xff] %vm527_vm8, %v524_v22 }
 0x326   :  { %v695_v45 = vpop.permute.xlu0 %694 }
 0x327   :  { %700 = vst.msk [vmem:[#allocation2 + $0x8] sm:$0xff] %vm698_vm9, %v695_v45 }
 0x328   :  { %871 = vst.msk [vmem:[#allocation2 + $0x8] sm:$0xff] %vm869_vm10, %v866_v46 }
 0x32f   :  { %v873_v43 = vld [vmem:[#allocation2 + $0x8] sm:$0xff] }
 0x330   :  { %v877_v47 = vadd.f32 %v873_v43, %v1228_v13 }
 0x332   :  { %879 = vst.msk [vmem:[#allocation12 + $0x8] sm:$0xff] %vm108_vm0, %v877_v47 }
 0x334   :  { %v864_v48 = vpop.permute.xlu1 %863 }
 0x335   :  { %870 = vst.msk [vmem:[#allocation2] sm:$0xff] %vm869_vm10, %v864_v48 }
 0x33c   :  { %v872_v49 = vld [vmem:[#allocation2] sm:$0xff] }
 0x33d   :  { %v876_v50 = vadd.f32 %v872_v49, %v1220_v10 }
 0x33f   :  { %878 = vst.msk [vmem:[#allocation12] sm:$0xff] %vm108_vm0, %v876_v50 }
 0x340   :  { %892 = dma.vmem_to_hbm [thread:$0]  %s885_s26, 256, %s887_s7, [#allocation5], %s1143_s29, %s1143_s29, %s1144_s30  }
 0x341   :  { %1140 = dma.done.wait [#allocation5], 256  }
 0x342   :  { %1141 = vsyncadd [#allocation5], 4294967040 }
 0x343   :  { %897 = vsyncpa [#allocation4], 1 }
 0x344   :  { %898 = vsyncpa [#allocation7], 1 }
 0x345   :  { %899 = vsyncpa [#allocation10], 1 }
 0x346   :  { %900 = vsyncpa [#allocation5], 1 }

</bundles_post_ra>
